<compile_context>
chip_gen: v7x
topology: tpu7x:2x2x1
jax: 0.10.0
libtpu: 0.0.40
codegen_flags: <defaults>
</compile_context>

<pallas_src>
import math

import jax
import jax.numpy as jnp
from jax.experimental import pallas as pl
from jax.experimental.pallas import tpu as pltpu

# ---- model config (small, deterministic) -------------------------------
B = 2            # batch
T = 8            # sequence length (== block_size)
C = 32           # n_embd
N_HEAD = 4       # n_head
HEAD_DIM = C // N_HEAD
LN_EPS = 1e-5
_SCALE = 1.0 / math.sqrt(HEAD_DIM)
_BLK_MASK = ~(T - 1)     # -8; valid because T is a power of two


def _layer_norm(v, w, b):
    mu = jnp.mean(v, axis=-1, keepdims=True)
    var = jnp.mean((v - mu) ** 2, axis=-1, keepdims=True)
    return (v - mu) * jax.lax.rsqrt(var + LN_EPS) * w + b


def _new_gelu(x):
    # x*x*x instead of jnp.power(x, 3.0): two VPU muls, keeps the single EUP
    # port free for the tanh.
    return 0.5 * x * (1.0 + jnp.tanh(
        math.sqrt(2.0 / math.pi) * (x + 0.044715 * (x * x * x))))


def block_kernel(x_ref, w_in_ref, w_out_ref, vec_ref, o_ref):
    """Whole transformer block in one grid-less invocation.

    x_ref    : (B*T, C)  f32   activations flattened over (batch, time)
    w_in_ref : (C, 8*C)  bf16  [w_attn (3C) | w_proj (C) | w_fc (4C)]
    w_out_ref: (4*C, C)  bf16  MLP output projection
    vec_ref  : (4, 128)  f32   row0=[ln1_w|ln1_b|ln2_w|ln2_b],
                               row1=[b_attn|b_proj], row2=b_fc,
                               row3=[b_mlp_proj|pad]
    o_ref    : (B*T, C)  f32   output (reshaped to (B,T,C) by the wrapper)
    """
    bf16 = jnp.bfloat16
    x = x_ref[...]                                  # (B*T, C) f32
    w_in = w_in_ref[...]                            # bf16
    w_out = w_out_ref[...]                          # bf16
    vec = vec_ref[...]                              # f32

    # --- unpack parameter slabs (static slices) ---
    ln1_w = vec[0:1, 0 * C:1 * C]
    ln1_b = vec[0:1, 1 * C:2 * C]
    ln2_w = vec[0:1, 2 * C:3 * C]
    ln2_b = vec[0:1, 3 * C:4 * C]
    b_attn = vec[1:2, 0:3 * C]                      # (1, 3C)
    b_proj = vec[1:2, 3 * C:4 * C]                  # (1, C)
    b_fc = vec[2:3, 0:4 * C]                        # (1, 4C)
    b_mp = vec[3:4, 0:C]                            # (1, C)

    w_attn = w_in[:, 0:3 * C]                       # (C, 3C) bf16
    w_proj = w_in[:, 3 * C:4 * C]                   # (C, C)  bf16
    w_fc = w_in[:, 4 * C:8 * C]                     # (C, 4C) bf16

    # ---------------- attention branch ----------------
    x_ln = _layer_norm(x, ln1_w, ln1_b)                              # f32
    qkv = jnp.dot(x_ln.astype(bf16), w_attn,
                  preferred_element_type=jnp.float32) + b_attn       # (B*T,3C) f32

    # Single slice+reshape per tensor; head axis becomes a batch dim below.
    qkv_b = qkv.astype(bf16)
    q = qkv_b[:, 0 * C:1 * C].reshape(B * T, N_HEAD, HEAD_DIM)
    k = qkv_b[:, 1 * C:2 * C].reshape(B * T, N_HEAD, HEAD_DIM)
    v = qkv_b[:, 2 * C:3 * C].reshape(B * T, N_HEAD, HEAD_DIM)

    # Block-diagonal (per-batch) causal mask over the flattened B*T axis,
    # built once with shifts/ands (T is a power of two -> no integer divide).
    rows = jax.lax.broadcasted_iota(jnp.int32, (B * T, B * T), 0)
    cols = jax.lax.broadcasted_iota(jnp.int32, (B * T, B * T), 1)
    mask = ((rows & _BLK_MASK) == (cols & _BLK_MASK)) & (cols <= rows)

    att = jnp.einsum('qhd,khd->hqk', q, k,
                     preferred_element_type=jnp.float32) * _SCALE    # (H,BT,BT) f32
    att = jnp.where(mask[None, :, :], att, -jnp.inf)
    att = att - jnp.max(att, axis=-1, keepdims=True)
    p = jnp.exp(att)
    # Divide -> EUP reciprocal (otherwise-idle slot).
    p = p * pl.reciprocal(jnp.sum(p, axis=-1, keepdims=True), approx=True)
    # attn_dropout is identity in eval mode.

    y = jnp.einsum('hqk,khd->qhd', p.astype(bf16), v,
                   preferred_element_type=jnp.float32)               # (BT,H,hd) f32
    y = y.reshape(B * T, C)
    y = jnp.dot(y.astype(bf16), w_proj,
                preferred_element_type=jnp.float32) + b_proj
    # resid_dropout is identity in eval mode.
    x = x + y                                       # residual 1

    # ---------------- MLP branch ----------------
    x_ln2 = _layer_norm(x, ln2_w, ln2_b)
    h_fc = jnp.dot(x_ln2.astype(bf16), w_fc,
                   preferred_element_type=jnp.float32) + b_fc
    h_act = _new_gelu(h_fc)                                          # f32 VPU/EUP
    mlp_out = jnp.dot(h_act.astype(bf16), w_out,
                      preferred_element_type=jnp.float32) + b_mp
    # Direct (B*T, C) store; no lane-repack (output is only 2 vregs).
    o_ref[...] = (x + mlp_out).astype(o_ref.dtype)


def pack_params(p):
    """Coalesce the 12 parameter tensors into 3 lane-dense slabs.

    Run ONCE at init (hoisted out of the per-forward path).
    Weight slabs are pre-cast to bf16 for single-pass MXU matmuls.
    """
    w_in = jnp.concatenate([p["w_attn"], p["w_proj"], p["w_fc"]],
                           axis=1).astype(jnp.bfloat16)          # (C, 8C) = (32,256)
    w_out = p["w_mlp_proj"].astype(jnp.bfloat16)                 # (4C, C) = (128,32)
    row0 = jnp.concatenate([p["ln1_w"], p["ln1_b"], p["ln2_w"], p["ln2_b"]])
    row1 = jnp.concatenate([p["b_attn"], p["b_proj"]])
    row2 = p["b_fc"]
    row3 = jnp.concatenate([p["b_mlp_proj"], jnp.zeros((3 * C,), jnp.float32)])
    vec = jnp.stack([row0, row1, row2, row3], axis=0)            # (4, 128) f32
    return w_in, w_out, vec


@jax.jit
def block_forward(x, w_in, w_out, vec):
    """x: (B, T, C) float32, pre-packed parameter slabs -> (B, T, C) float32."""
    x2d = x.reshape(B * T, C)
    vmem_spec = pl.BlockSpec(memory_space=pltpu.MemorySpace.VMEM)
    out2d = pl.pallas_call(
        block_kernel,
        out_shape=jax.ShapeDtypeStruct((B * T, C), x.dtype),
        in_specs=[vmem_spec, vmem_spec, vmem_spec, vmem_spec],
        out_specs=vmem_spec,
        cost_estimate=pl.CostEstimate(
            flops=430_000, transcendentals=3_200, bytes_accessed=30_000),
    )(x2d, w_in, w_out, vec)
    return out2d.reshape(B, T, C)


def init_params(key):
    ks = jax.random.split(key, 8)
    std = 0.02
    return {
        # LayerNorms: weight=1, bias=0 (PyTorch default init)
        "ln1_w": jnp.ones((C,), jnp.float32),
        "ln1_b": jnp.zeros((C,), jnp.float32),
        "ln2_w": jnp.ones((C,), jnp.float32),
        "ln2_b": jnp.zeros((C,), jnp.float32),
        # attention qkv + output projection (stored [in, out])
        "w_attn": std * jax.random.normal(ks[0], (C, 3 * C), jnp.float32),
        "b_attn": std * jax.random.normal(ks[1], (3 * C,), jnp.float32),
        "w_proj": std * jax.random.normal(ks[2], (C, C), jnp.float32),
        "b_proj": std * jax.random.normal(ks[3], (C,), jnp.float32),
        # MLP
        "w_fc": std * jax.random.normal(ks[4], (C, 4 * C), jnp.float32),
        "b_fc": std * jax.random.normal(ks[5], (4 * C,), jnp.float32),
        "w_mlp_proj": std * jax.random.normal(ks[6], (4 * C, C), jnp.float32),
        "b_mlp_proj": std * jax.random.normal(ks[7], (C,), jnp.float32),
    }


def block_forward_ref(x, p):
    """Pure-JAX f32 reference mirroring the PyTorch Block.forward (eval mode)."""
    def attn(h):
        qkv = h @ p["w_attn"] + p["b_attn"]
        q, k, v = jnp.split(qkv, 3, axis=-1)
        q = q.reshape(B, T, N_HEAD, HEAD_DIM).transpose(0, 2, 1, 3)
        k = k.reshape(B, T, N_HEAD, HEAD_DIM).transpose(0, 2, 1, 3)
        v = v.reshape(B, T, N_HEAD, HEAD_DIM).transpose(0, 2, 1, 3)
        att = (q @ k.transpose(0, 1, 3, 2)) / math.sqrt(HEAD_DIM)
        mask = jnp.tril(jnp.ones((T, T), bool))
        att = jnp.where(mask, att, -jnp.inf)
        att = jax.nn.softmax(att, axis=-1)
        y = (att @ v).transpose(0, 2, 1, 3).reshape(B, T, C)
        return y @ p["w_proj"] + p["b_proj"]

    def mlp(h):
        f = h @ p["w_fc"] + p["b_fc"]
        f = _new_gelu(f)
        return f @ p["w_mlp_proj"] + p["b_mlp_proj"]

    x = x + attn(_layer_norm(x, p["ln1_w"], p["ln1_b"]))
    x = x + mlp(_layer_norm(x, p["ln2_w"], p["ln2_b"]))
    return x


if __name__ == "__main__":
    key = jax.random.PRNGKey(0)
    k_in, k_par = jax.random.split(key)
    x = jax.random.normal(k_in, (B, T, C), jnp.float32)
    params = init_params(k_par)

    # Pack parameters ONCE (hoisted out of the forward path).
    w_in, w_out, vec = pack_params(params)

    out = jax.block_until_ready(block_forward(x, w_in, w_out, vec))
    ref = block_forward_ref(x, params)

    assert out.shape == (B, T, C)
    max_diff = jnp.max(jnp.abs(out - ref))
    # bf16 MXU operands (f32 accumulate) + approx-reciprocal softmax give a
    # few e-4 deviation from the all-f32 reference; 2e-3 leaves ample margin.
    assert jnp.allclose(out, ref, atol=2e-3, rtol=2e-3), (
        f"max abs diff {max_diff}")

    print("KERNEL_OK")
</pallas_src>

<mosaic_0001>
module attributes {stable_mosaic.version = 11 : i64} {
  func.func @block_kernel(%arg0: memref<16x32xf32, #tpu.memory_space<vmem>>, %arg1: memref<32x256xbf16, #tpu.memory_space<vmem>>, %arg2: memref<128x32xbf16, #tpu.memory_space<vmem>>, %arg3: memref<4x128xf32, #tpu.memory_space<vmem>>, %arg4: memref<16x32xf32, #tpu.memory_space<vmem>>) attributes {dimension_semantics = [], scalar_prefetch = 0 : i64, scratch_operands = 0 : i64, tpu.core_type = #tpu.core_type<tc>} {
    %c0 = arith.constant 0 : index
    %c0_0 = arith.constant 0 : index
    %0 = vector.load %arg0[%c0, %c0_0] : memref<16x32xf32, #tpu.memory_space<vmem>>, vector<16x32xf32>
    %c0_1 = arith.constant 0 : index
    %c0_2 = arith.constant 0 : index
    %1 = vector.load %arg1[%c0_1, %c0_2] : memref<32x256xbf16, #tpu.memory_space<vmem>>, vector<32x256xbf16>
    %c0_3 = arith.constant 0 : index
    %c0_4 = arith.constant 0 : index
    %2 = vector.load %arg2[%c0_3, %c0_4] : memref<128x32xbf16, #tpu.memory_space<vmem>>, vector<128x32xbf16>
    %c0_5 = arith.constant 0 : index
    %c0_6 = arith.constant 0 : index
    %3 = vector.load %arg3[%c0_5, %c0_6] : memref<4x128xf32, #tpu.memory_space<vmem>>, vector<4x128xf32>
    %4 = vector.extract_strided_slice %3 {offsets = [0, 0], sizes = [1, 32], strides = [1, 1]} : vector<4x128xf32> to vector<1x32xf32>
    %5 = vector.extract_strided_slice %3 {offsets = [0, 32], sizes = [1, 32], strides = [1, 1]} : vector<4x128xf32> to vector<1x32xf32>
    %6 = vector.extract_strided_slice %3 {offsets = [0, 64], sizes = [1, 32], strides = [1, 1]} : vector<4x128xf32> to vector<1x32xf32>
    %7 = vector.extract_strided_slice %3 {offsets = [0, 96], sizes = [1, 32], strides = [1, 1]} : vector<4x128xf32> to vector<1x32xf32>
    %8 = vector.extract_strided_slice %3 {offsets = [1, 0], sizes = [1, 96], strides = [1, 1]} : vector<4x128xf32> to vector<1x96xf32>
    %9 = vector.extract_strided_slice %3 {offsets = [1, 96], sizes = [1, 32], strides = [1, 1]} : vector<4x128xf32> to vector<1x32xf32>
    %10 = vector.extract_strided_slice %3 {offsets = [2, 0], sizes = [1, 128], strides = [1, 1]} : vector<4x128xf32> to vector<1x128xf32>
    %11 = vector.extract_strided_slice %3 {offsets = [3, 0], sizes = [1, 32], strides = [1, 1]} : vector<4x128xf32> to vector<1x32xf32>
    %12 = vector.extract_strided_slice %1 {offsets = [0, 0], sizes = [32, 96], strides = [1, 1]} : vector<32x256xbf16> to vector<32x96xbf16>
    %13 = vector.extract_strided_slice %1 {offsets = [0, 96], sizes = [32, 32], strides = [1, 1]} : vector<32x256xbf16> to vector<32x32xbf16>
    %14 = vector.extract_strided_slice %1 {offsets = [0, 128], sizes = [32, 128], strides = [1, 1]} : vector<32x256xbf16> to vector<32x128xbf16>
    %cst = arith.constant dense<0.000000e+00> : vector<16xf32>
    %15 = vector.multi_reduction <add>, %0, %cst [1] : vector<16x32xf32> to vector<16xf32>
    %16 = vector.shape_cast %15 : vector<16xf32> to vector<16x1xf32>
    %cst_7 = arith.constant 3.200000e+01 : f32
    %17 = vector.broadcast %cst_7 : f32 to vector<16x1xf32>
    %18 = arith.divf %16, %17 : vector<16x1xf32>
    %19 = vector.broadcast %18 : vector<16x1xf32> to vector<16x32xf32>
    %20 = arith.subf %0, %19 : vector<16x32xf32>
    %21 = arith.mulf %20, %20 : vector<16x32xf32>
    %cst_8 = arith.constant dense<0.000000e+00> : vector<16xf32>
    %22 = vector.multi_reduction <add>, %21, %cst_8 [1] : vector<16x32xf32> to vector<16xf32>
    %23 = vector.shape_cast %22 : vector<16xf32> to vector<16x1xf32>
    %cst_9 = arith.constant 3.200000e+01 : f32
    %24 = vector.broadcast %cst_9 : f32 to vector<16x1xf32>
    %25 = arith.divf %23, %24 : vector<16x1xf32>
    %26 = vector.broadcast %18 : vector<16x1xf32> to vector<16x32xf32>
    %27 = arith.subf %0, %26 : vector<16x32xf32>
    %cst_10 = arith.constant 9.99999974E-6 : f32
    %28 = vector.broadcast %cst_10 : f32 to vector<16x1xf32>
    %29 = arith.addf %25, %28 : vector<16x1xf32>
    %30 = math.rsqrt %29 : vector<16x1xf32>
    %31 = vector.broadcast %30 : vector<16x1xf32> to vector<16x32xf32>
    %32 = arith.mulf %27, %31 : vector<16x32xf32>
    %33 = vector.broadcast %4 : vector<1x32xf32> to vector<16x32xf32>
    %34 = arith.mulf %32, %33 : vector<16x32xf32>
    %35 = vector.broadcast %5 : vector<1x32xf32> to vector<16x32xf32>
    %36 = arith.addf %34, %35 : vector<16x32xf32>
    %37 = arith.truncf %36 : vector<16x32xf32> to vector<16x32xbf16>
    %cst_11 = arith.constant dense<0.000000e+00> : vector<16x96xf32>
    %38 = tpu.matmul %37, %12, %cst_11 {dimension_numbers = #tpu.dot_dimension_numbers<[1], [0], [0], [1], [0, 0, 1, 1], [], []>} : vector<16x32xbf16>, vector<32x96xbf16>, vector<16x96xf32> -> vector<16x96xf32>
    %39 = vector.broadcast %8 : vector<1x96xf32> to vector<16x96xf32>
    %40 = arith.addf %38, %39 : vector<16x96xf32>
    %41 = arith.truncf %40 : vector<16x96xf32> to vector<16x96xbf16>
    %42 = vector.extract_strided_slice %41 {offsets = [0, 0], sizes = [16, 32], strides = [1, 1]} : vector<16x96xbf16> to vector<16x32xbf16>
    %43 = vector.shape_cast %42 : vector<16x32xbf16> to vector<16x4x8xbf16>
    %44 = vector.extract_strided_slice %41 {offsets = [0, 32], sizes = [16, 32], strides = [1, 1]} : vector<16x96xbf16> to vector<16x32xbf16>
    %45 = vector.shape_cast %44 : vector<16x32xbf16> to vector<16x4x8xbf16>
    %46 = vector.extract_strided_slice %41 {offsets = [0, 64], sizes = [16, 32], strides = [1, 1]} : vector<16x96xbf16> to vector<16x32xbf16>
    %47 = vector.shape_cast %46 : vector<16x32xbf16> to vector<16x4x8xbf16>
    %48 = tpu.iota {dimensions = array<i32: 0>} : vector<16x16xi32>
    %49 = tpu.iota {dimensions = array<i32: 1>} : vector<16x16xi32>
    %c-8_i32 = arith.constant -8 : i32
    %50 = vector.broadcast %c-8_i32 : i32 to vector<16x16xi32>
    %51 = arith.andi %48, %50 : vector<16x16xi32>
    %c-8_i32_12 = arith.constant -8 : i32
    %52 = vector.broadcast %c-8_i32_12 : i32 to vector<16x16xi32>
    %53 = arith.andi %49, %52 : vector<16x16xi32>
    %54 = arith.cmpi eq, %51, %53 : vector<16x16xi32>
    %55 = arith.cmpi sle, %49, %48 : vector<16x16xi32>
    %56 = arith.andi %54, %55 : vector<16x16xi1>
    "tpu.trace_start"() <{level = 10 : i32, message = "qhd,khd->hqk"}> : () -> ()
    %cst_13 = arith.constant dense<0.000000e+00> : vector<4x16x16xf32>
    %57 = tpu.matmul %43, %45, %cst_13 {dimension_numbers = #tpu.dot_dimension_numbers<[2], [2], [0], [0], [0, 1, 0, 0, 1, 0], [1], [1]>} : vector<16x4x8xbf16>, vector<16x4x8xbf16>, vector<4x16x16xf32> -> vector<4x16x16xf32>
    "tpu.trace_stop"() : () -> ()
    %cst_14 = arith.constant 0.353553385 : f32
    %58 = vector.broadcast %cst_14 : f32 to vector<4x16x16xf32>
    %59 = arith.mulf %57, %58 : vector<4x16x16xf32>
    %60 = vector.shape_cast %56 : vector<16x16xi1> to vector<1x16x16xi1>
    %cst_15 = arith.constant 0xFF800000 : f32
    %61 = vector.shape_cast %60 : vector<1x16x16xi1> to vector<1x16x16xi1>
    %62 = vector.broadcast %61 : vector<1x16x16xi1> to vector<4x16x16xi1>
    %63 = vector.broadcast %cst_15 : f32 to vector<4x16x16xf32>
    %64 = arith.select %62, %59, %63 : vector<4x16x16xi1>, vector<4x16x16xf32>
    %cst_16 = arith.constant dense<0xFF800000> : vector<4x16xf32>
    %65 = vector.multi_reduction <maximumf>, %64, %cst_16 [2] : vector<4x16x16xf32> to vector<4x16xf32>
    %66 = vector.shape_cast %65 : vector<4x16xf32> to vector<4x16x1xf32>
    %67 = vector.broadcast %66 : vector<4x16x1xf32> to vector<4x16x16xf32>
    %68 = arith.subf %64, %67 : vector<4x16x16xf32>
    %69 = math.exp %68 : vector<4x16x16xf32>
    %cst_17 = arith.constant dense<0.000000e+00> : vector<4x16xf32>
    %70 = vector.multi_reduction <add>, %69, %cst_17 [2] : vector<4x16x16xf32> to vector<4x16xf32>
    %71 = vector.shape_cast %70 : vector<4x16xf32> to vector<4x16x1xf32>
    %72 = tpu.reciprocal %71 {approx = true} : vector<4x16x1xf32> -> vector<4x16x1xf32>
    %73 = vector.broadcast %72 : vector<4x16x1xf32> to vector<4x16x16xf32>
    %74 = arith.mulf %69, %73 : vector<4x16x16xf32>
    %75 = arith.truncf %74 : vector<4x16x16xf32> to vector<4x16x16xbf16>
    "tpu.trace_start"() <{level = 10 : i32, message = "hqk,khd->qhd"}> : () -> ()
    %cst_18 = arith.constant dense<0.000000e+00> : vector<4x8x16xf32>
    %76 = tpu.matmul %47, %75, %cst_18 {dimension_numbers = #tpu.dot_dimension_numbers<[0], [2], [2], [1], [0, 1, 0, 2, 1, 1], [1], [0]>} : vector<16x4x8xbf16>, vector<4x16x16xbf16>, vector<4x8x16xf32> -> vector<4x8x16xf32>
    %77 = tpu.transpose %76, [2, 0, 1] : vector<4x8x16xf32> -> vector<16x4x8xf32>
    "tpu.trace_stop"() : () -> ()
    %78 = vector.shape_cast %77 : vector<16x4x8xf32> to vector<16x32xf32>
    %79 = arith.truncf %78 : vector<16x32xf32> to vector<16x32xbf16>
    %cst_19 = arith.constant dense<0.000000e+00> : vector<16x32xf32>
    %80 = tpu.matmul %79, %13, %cst_19 {dimension_numbers = #tpu.dot_dimension_numbers<[1], [0], [0], [1], [0, 0, 1, 1], [], []>} : vector<16x32xbf16>, vector<32x32xbf16>, vector<16x32xf32> -> vector<16x32xf32>
    %81 = vector.broadcast %9 : vector<1x32xf32> to vector<16x32xf32>
    %82 = arith.addf %80, %81 : vector<16x32xf32>
    %83 = arith.addf %0, %82 : vector<16x32xf32>
    %cst_20 = arith.constant dense<0.000000e+00> : vector<16xf32>
    %84 = vector.multi_reduction <add>, %83, %cst_20 [1] : vector<16x32xf32> to vector<16xf32>
    %85 = vector.shape_cast %84 : vector<16xf32> to vector<16x1xf32>
    %cst_21 = arith.constant 3.200000e+01 : f32
    %86 = vector.broadcast %cst_21 : f32 to vector<16x1xf32>
    %87 = arith.divf %85, %86 : vector<16x1xf32>
    %88 = vector.broadcast %87 : vector<16x1xf32> to vector<16x32xf32>
    %89 = arith.subf %83, %88 : vector<16x32xf32>
    %90 = arith.mulf %89, %89 : vector<16x32xf32>
    %cst_22 = arith.constant dense<0.000000e+00> : vector<16xf32>
    %91 = vector.multi_reduction <add>, %90, %cst_22 [1] : vector<16x32xf32> to vector<16xf32>
    %92 = vector.shape_cast %91 : vector<16xf32> to vector<16x1xf32>
    %cst_23 = arith.constant 3.200000e+01 : f32
    %93 = vector.broadcast %cst_23 : f32 to vector<16x1xf32>
    %94 = arith.divf %92, %93 : vector<16x1xf32>
    %95 = vector.broadcast %87 : vector<16x1xf32> to vector<16x32xf32>
    %96 = arith.subf %83, %95 : vector<16x32xf32>
    %cst_24 = arith.constant 9.99999974E-6 : f32
    %97 = vector.broadcast %cst_24 : f32 to vector<16x1xf32>
    %98 = arith.addf %94, %97 : vector<16x1xf32>
    %99 = math.rsqrt %98 : vector<16x1xf32>
    %100 = vector.broadcast %99 : vector<16x1xf32> to vector<16x32xf32>
    %101 = arith.mulf %96, %100 : vector<16x32xf32>
    %102 = vector.broadcast %6 : vector<1x32xf32> to vector<16x32xf32>
    %103 = arith.mulf %101, %102 : vector<16x32xf32>
    %104 = vector.broadcast %7 : vector<1x32xf32> to vector<16x32xf32>
    %105 = arith.addf %103, %104 : vector<16x32xf32>
    %106 = arith.truncf %105 : vector<16x32xf32> to vector<16x32xbf16>
    %cst_25 = arith.constant dense<0.000000e+00> : vector<16x128xf32>
    %107 = tpu.matmul %106, %14, %cst_25 {dimension_numbers = #tpu.dot_dimension_numbers<[1], [0], [0], [1], [0, 0, 1, 1], [], []>} : vector<16x32xbf16>, vector<32x128xbf16>, vector<16x128xf32> -> vector<16x128xf32>
    %108 = vector.broadcast %10 : vector<1x128xf32> to vector<16x128xf32>
    %109 = arith.addf %107, %108 : vector<16x128xf32>
    %cst_26 = arith.constant 5.000000e-01 : f32
    %110 = vector.broadcast %cst_26 : f32 to vector<16x128xf32>
    %111 = arith.mulf %110, %109 : vector<16x128xf32>
    %112 = arith.mulf %109, %109 : vector<16x128xf32>
    %113 = arith.mulf %112, %109 : vector<16x128xf32>
    %cst_27 = arith.constant 4.471500e-02 : f32
    %114 = vector.broadcast %cst_27 : f32 to vector<16x128xf32>
    %115 = arith.mulf %114, %113 : vector<16x128xf32>
    %116 = arith.addf %109, %115 : vector<16x128xf32>
    %cst_28 = arith.constant 0.797884583 : f32
    %117 = vector.broadcast %cst_28 : f32 to vector<16x128xf32>
    %118 = arith.mulf %117, %116 : vector<16x128xf32>
    %119 = math.tanh %118 : vector<16x128xf32>
    %cst_29 = arith.constant 1.000000e+00 : f32
    %120 = vector.broadcast %cst_29 : f32 to vector<16x128xf32>
    %121 = arith.addf %120, %119 : vector<16x128xf32>
    %122 = arith.mulf %111, %121 : vector<16x128xf32>
    %123 = arith.truncf %122 : vector<16x128xf32> to vector<16x128xbf16>
    %cst_30 = arith.constant dense<0.000000e+00> : vector<16x32xf32>
    %124 = tpu.matmul %123, %2, %cst_30 {dimension_numbers = #tpu.dot_dimension_numbers<[1], [0], [0], [1], [0, 0, 1, 1], [], []>} : vector<16x128xbf16>, vector<128x32xbf16>, vector<16x32xf32> -> vector<16x32xf32>
    %125 = vector.broadcast %11 : vector<1x32xf32> to vector<16x32xf32>
    %126 = arith.addf %124, %125 : vector<16x32xf32>
    %127 = arith.addf %83, %126 : vector<16x32xf32>
    %c0_31 = arith.constant 0 : index
    %c0_32 = arith.constant 0 : index
    %128 = vector.load %arg4[%c0_31, %c0_32] : memref<16x32xf32, #tpu.memory_space<vmem>>, vector<16x32xf32>
    tpu.vector_store %arg4[%c0_31, %c0_32], %127 {strides = array<i32>} : memref<16x32xf32, #tpu.memory_space<vmem>>, vector<16x32xf32>,
    return
  }
}

</mosaic_0001>

<bundles_post_ra>
// kernel: block_forward.1
= control target key start
LH: loop header
LB: loop body
LE: loop exit
PB: predicated region body
PF: predicated region fallthrough
CT: control target
= control target key end

     0   :  { %vm42_vm0 = vcmask 261120   ;;  %s2113_s0 = inlined_call_operand.vmem [shape: f32[16,32], index: 0, kind: input, shape index: {}]   ;;  %s2114_s1 = inlined_call_operand.vmem [shape: bf16[32,256], index: 1, kind: input, shape index: {}]   ;;  %s2115_s2 = inlined_call_operand.vmem [shape: bf16[128,32], index: 2, kind: input, shape index: {}]   ;;  %s2116_s3 = inlined_call_operand.vmem [shape: f32[4,128], index: 3, kind: input, shape index: {}]   ;;  %s2117_s4 = inlined_call_operand.hbm [shape: f32[16,32], index: 4, kind: output, shape index: {}]  }
   0x1   :  { %v1827_v0 = vld [vmem:[%s2113_s0] sm:$0xff]  ;;  %v1832_v1 = vld [vmem:[%s2113_s0 + $0x8] sm:$0xff] }
   0x2   :  { %v43_v2 = vsel %vm42_vm0, %v1827_v0, 0.0  ;;  %v46_v3 = vsel %vm42_vm0, %v1832_v1, 0.0 }
   0x3   :  { %44 = vadd.xlane.f32.xlu0 %v43_v2 }
   0x7   :  { %47 = vadd.xlane.f32.xlu0 %v46_v3 }
   0x8   :  { %9 = vsyncpa [#allocation3], 0  ;;  %v70_v4 = vlaneseq  ;;  %v41_v6 = vld [vmem:[%s2116_s3] sm:$0xf]  ;;  %s1784_s0 = smov 96   ;;  %v1785_v20 = vmov 0.0  }
   0x9   :  { %v1856_v19 = vld [vmem:[%s2114_s1] ss:$8 sps:$4 sm:$0xff]   ;;  %1578 = vmatprep.subr.bf16.mxu1 %v1785_v20  ;;  %1598 = vmatprep.subr.bf16.mxu0 %v1785_v20  ;;  %v1865_v21 = vld [vmem:[%s2114_s1 + $0x10] ss:$8 sps:$4 sm:$0xff]   ;;  %vm1786_vm1 = vmmov 0   ;;  %s1787_s25 = smov 120  }
   0xa   :  { %v1839_v5 = vshrl.u32 %v70_v4, 7  ;;  %1579 = vmatpush3.bf16.msra.mxu1 %v1856_v19  ;;  %1582 = vmatprep.mubr.msk.bf16.mxu1 %vm1786_vm1, %v1785_v20  ;;  %s1788_s26 = smov 112   ;;  %s1789_s27 = smov 104   ;;  %vm245_vm2 = vcmask 1043456   ;;  %vm241_vm3 = vcmask 64512   ;;  %v155_v62 = vand.u32 127, %v70_v4 }
   0xb   :  { %1580 = vmatprep.subr.bf16.mxu1 %v1785_v20  ;;  %1600 = vmatprep.mubr.msk.bf16.mxu0 %vm1786_vm1, %v1785_v20  ;;  %vm451_vm9 = vcmask 130048   ;;  %s1790_s28 = smov 64   ;;  %s1794_s7 = smov 16   ;;  %vm1232_vm11 = vcmask 195584  }
   0xc   :  { %v72_v7 = vsub.s32 0, %v1839_v5  ;;  %v85_v38 = vsub.s32 1, %v1839_v5  ;;  %v153_v63 = vadd.s32 8, %v1839_v5  ;;  %v156_v2 = vand.u32 4294967288, %v1839_v5  ;;  %s1795_s8 = smov 8   ;;  %s1796_s9 = smov 24  }
   0xd   :  { %v158_v3 = vand.u32 4294967288, %v155_v62  ;;  %vm161_vm5 = vcmp.le.s32.totalorder %v155_v62, %v1839_v5 }
   0xe   :  { %v1845_v8 = vrot.slane %v41_v6, %v72_v7  ;;  %1581 = vmatpush3.bf16.msra.mxu1 %v1865_v21  ;;  %v1879_v39 = vrot.slane %v41_v6, %v85_v38  ;;  %v157_v6 = vand.u32 4294967288, %v153_v63  ;;  %vm162_vm7 = vcmp.le.s32.totalorder %v155_v62, %v153_v63 }
   0xf   :  { %1586 = vmatprep.subr.bf16.mxu1 %v1785_v20  ;;  %vm159_vm4 = vcmp.eq.s32.totalorder %v156_v2, %v158_v3 }
  0x10   :  { %vm160_vm6 = vcmp.eq.s32.totalorder %v157_v6, %v158_v3  ;;  %vm1930_vm8 = vmand %vm159_vm4, %vm161_vm5 }
  0x11   :  { %vm1934_vm10 = vmand %vm160_vm6, %vm162_vm7 }
  0x1d   :  { %77 = vrot.lane.b32.xlu0 %v1845_v8, %s1784_s0 }
  0x90   :  { %v45_v9 = vpop.xlane.xlu0 %44 }
  0x91   :  { %v50_v10 = vmul.f32 0.03125, %v45_v9 }
  0x93   :  { %v52_v11 = vsub.f32 %v1827_v0, %v50_v10 }
  0x94   :  { %v48_v12 = vpop.xlane.xlu0 %47 }
  0x95   :  { %v51_v13 = vmul.f32 0.03125, %v48_v12  ;;  %v54_v14 = vmul.f32 %v52_v11, %v52_v11 }
  0x97   :  { %v53_v15 = vsub.f32 %v1832_v1, %v51_v13  ;;  %v56_v16 = vsel %vm42_vm0, %v54_v14, 0.0 }
  0x98   :  { %57 = vadd.xlane.f32.xlu1 %v56_v16  ;;  %v78_v33 = vpop.permute.xlu0 %77 }
  0x99   :  { %v55_v17 = vmul.f32 %v53_v15, %v53_v15 }
  0x9b   :  { %v59_v18 = vsel %vm42_vm0, %v55_v17, 0.0 }
  0x9c   :  { %60 = vadd.xlane.f32.xlu1 %v59_v18 }
 0x125   :  { %v58_v22 = vpop.xlane.xlu1 %57 }
 0x126   :  { %v62_v23 = vmul.f32 0.03125, %v58_v22 }
 0x128   :  { %v64_v24 = vadd.f32 1e-05, %v62_v23 }
 0x129   :  { %v61_v25 = vpop.xlane.xlu1 %60 }
 0x12a   :  { %1715 = vrsqrt.f32 %v64_v24  ;;  %v63_v26 = vmul.f32 0.03125, %v61_v25 }
 0x12c   :  { %v65_v27 = vadd.f32 1e-05, %v63_v26 }
 0x12e   :  { %1717 = vrsqrt.f32 %v65_v27 }
 0x134   :  { %v1716_v28 = vpop.eup %1715 }
 0x135   :  { %v68_v29 = vmul.f32 %v1716_v28, %v52_v11 }
 0x137   :  { %v74_v32 = vmul.f32 %v1845_v8, %v68_v29 }
 0x138   :  { %v1718_v30 = vpop.eup %1717 }
 0x139   :  { %v69_v31 = vmul.f32 %v1718_v30, %v53_v15  ;;  %v80_v35 = vadd.f32 %v78_v33, %v74_v32 }
 0x13b   :  { %v75_v34 = vmul.f32 %v1845_v8, %v69_v31 }
 0x13d   :  { %v81_v36 = vadd.f32 %v78_v33, %v75_v34 }
 0x13f   :  { %v82_v37 = vpack.c.bf16 %v81_v36, %v80_v35 }
 0x141   :  { %1583 = vmatmul.mubr.msk.bf16.vlgmr.msra.gmra.mrb[0].mxu1 %vm42_vm0, %v82_v37 }
 0x142   :  { %1588 = vmatprep.mubr.msk.bf16.mxu1 %vm1786_vm1, %v1785_v20 }
 0x214   :  { %v136_v40 = vpop.f32.mrb[0].mxu1 }
 0x215   :  { %v1584_v41 = vpop.f32.mrb[1].mxu1  ;;  %v137_v43 = vadd.f32 %v136_v40, %v1879_v39 }
 0x216   :  { %v139_v42 = vpop.f32.mrb[2].mxu1 }
 0x217   :  { %v140_v44 = vadd.f32 %v139_v42, %v1879_v39  ;;  %v1585_v45 = vpop.f32.mrb[3].mxu1 }
 0x219   :  { %v1883_v46 = vpack.c.bf16 %v140_v44, %v137_v43 }
 0x21b   :  { %165 = vrot.lane.b32.xlu0 %v1883_v46, %s1784_s0  ;;  %145 = vrot.lane.b32.xlu1 %v1883_v46, %s1787_s25 }
 0x21f   :  { %147 = vrot.lane.b32.xlu1 %v1883_v46, %s1788_s26 }
 0x223   :  { %149 = vrot.lane.b32.xlu1 %v1883_v46, %s1789_s27 }
 0x28d   :  { %v1890_v47 = vpop.permute.xlu1 %145  ;;  %v166_v50 = vpop.permute.xlu0 %165 }
 0x28e   :  { %167 = vrot.lane.b32.xlu1 %v1890_v47, %s1784_s0 }
 0x291   :  { %v1894_v48 = vpop.permute.xlu1 %147 }
 0x292   :  { %169 = vrot.lane.b32.xlu0 %v1894_v48, %s1784_s0 }
 0x295   :  { %v1898_v49 = vpop.permute.xlu1 %149 }
 0x296   :  { %171 = vrot.lane.b32.xlu1 %v1898_v49, %s1784_s0 }
 0x2b0   :  { %177 = vxpose.xlu0.c.b16.start.end [1/1] (short) (narrow) %v166_v50, 16 }
 0x300   :  { %v168_v51 = vpop.permute.xlu1 %167 }
 0x301   :  { %193 = vxpose.xlu1.c.b16.start.end [1/1] (short) (narrow) %v168_v51, 16 }
 0x304   :  { %v170_v52 = vpop.permute.xlu0 %169 }
 0x305   :  { %209 = vxpose.xlu0.c.b16.start.end [1/1] (short) (narrow) %v170_v52, 16 }
 0x308   :  { %v172_v53 = vpop.permute.xlu1 %171 }
 0x309   :  { %225 = vxpose.xlu0.c.b16.start.end [1/1] (short) (narrow) %v172_v53, 16 }
 0x316   :  { %v185_v54 = vpop.trf.xlu0 }
 0x317   :  { %v247_v55 = vsel %vm245_vm2, %v185_v54, 0 }
 0x318   :  { %1587 = vmatpush3.bf16.msra.mxu1 %v247_v55 }
 0x319   :  { %1592 = vmatprep.subr.bf16.mxu1 %v1785_v20 }
 0x31b   :  { %1589 = vmatmul.mubr.msk.bf16.vlgmr.msra.gmra.mrb[4].mxu1 %vm241_vm3, %v1883_v46 }
 0x31c   :  { %1594 = vmatprep.mubr.msk.bf16.mxu1 %vm1786_vm1, %v1785_v20 }
 0x367   :  { %v201_v56 = vpop.trf.xlu1 }
 0x368   :  { %v294_v57 = vsel %vm245_vm2, %v201_v56, 0 }
 0x369   :  { %1593 = vmatpush3.bf16.msra.mxu1 %v294_v57 }
 0x36a   :  { %1604 = vmatprep.subr.bf16.mxu1 %v1785_v20 }
 0x36b   :  { %v217_v58 = vpop.trf.xlu0 }
 0x36c   :  { %1595 = vmatmul.mubr.msk.bf16.vlgmr.msra.gmra.mrb[8].mxu1 %vm241_vm3, %v1890_v47  ;;  %v341_v59 = vsel %vm245_vm2, %v217_v58, 0 }
 0x36d   :  { %1599 = vmatpush3.bf16.msra.mxu0 %v341_v59  ;;  %1606 = vmatprep.mubr.msk.bf16.mxu1 %vm1786_vm1, %v1785_v20 }
 0x36e   :  { %1610 = vmatprep.subr.bf16.mxu0 %v1785_v20 }
 0x36f   :  { %v233_v60 = vpop.trf.xlu0 }
 0x370   :  { %v388_v61 = vsel %vm245_vm2, %v233_v60, 0  ;;  %1601 = vmatmul.mubr.msk.bf16.vlgmr.msra.gmra.mrb[0].mxu0 %vm241_vm3, %v1894_v48 }
 0x371   :  { %1605 = vmatpush3.bf16.msra.mxu1 %v388_v61  ;;  %1612 = vmatprep.mubr.msk.bf16.mxu0 %vm1786_vm1, %v1785_v20 }
 0x372   :  { %1616 = vmatprep.subr.bf16.mxu1 %v1785_v20 }
 0x374   :  { %1607 = vmatmul.mubr.msk.bf16.vlgmr.msra.gmra.mrb[12].mxu1 %vm241_vm3, %v1898_v49 }
 0x375   :  { %1618 = vmatprep.mubr.msk.bf16.mxu1 %vm1786_vm1, %v1785_v20 }
 0x3ee   :  { %v283_v7 = vpop.f32.mrb[4].mxu1 }
 0x3ef   :  { %v431_v10 = vmul.f32 0.35355338, %v283_v7  ;;  %v1590_v11 = vpop.f32.mrb[5].mxu1 }
 0x3f0   :  { %v286_v4 = vpop.f32.mrb[6].mxu1 }
 0x3f1   :  { %v432_v13 = vmul.f32 0.35355338, %v286_v4  ;;  %v1591_v14 = vpop.f32.mrb[7].mxu1  ;;  %v443_v15 = vsel %vm1930_vm8, %v431_v10, -inf }
 0x3f2   :  { %v452_v16 = vsel %vm451_vm9, %v443_v15, -inf }
 0x3f3   :  { %453 = vmax.xlane.f32.xlu0 %v452_v16  ;;  %v444_v17 = vsel %vm1934_vm10, %v432_v13, -inf }
 0x3f4   :  { %v455_v18 = vsel %vm451_vm9, %v444_v17, -inf }
 0x3f5   :  { %456 = vmax.xlane.f32.xlu1 %v455_v18 }
 0x43f   :  { %v330_v22 = vpop.f32.mrb[8].mxu1 }
 0x440   :  { %v433_v23 = vmul.f32 0.35355338, %v330_v22  ;;  %v1596_v24 = vpop.f32.mrb[9].mxu1 }
 0x441   :  { %v333_v25 = vpop.f32.mrb[10].mxu1 }
 0x442   :  { %v434_v26 = vmul.f32 0.35355338, %v333_v25  ;;  %v1597_v27 = vpop.f32.mrb[11].mxu1  ;;  %v445_v28 = vsel %vm1930_vm8, %v433_v23, -inf }
 0x443   :  { %v377_v29 = vpop.f32.mrb[0].mxu0  ;;  %v458_v30 = vsel %vm451_vm9, %v445_v28, -inf }
 0x444   :  { %v435_v31 = vmul.f32 0.35355338, %v377_v29  ;;  %v1602_v32 = vpop.f32.mrb[1].mxu0  ;;  %459 = vmax.xlane.f32.xlu0 %v458_v30  ;;  %v446_v33 = vsel %vm1934_vm10, %v434_v26, -inf }
 0x445   :  { %v380_v34 = vpop.f32.mrb[2].mxu0  ;;  %v461_v35 = vsel %vm451_vm9, %v446_v33, -inf }
 0x446   :  { %v436_v36 = vmul.f32 0.35355338, %v380_v34  ;;  %v1603_v37 = vpop.f32.mrb[3].mxu0  ;;  %462 = vmax.xlane.f32.xlu1 %v461_v35  ;;  %v447_v38 = vsel %vm1930_vm8, %v435_v31, -inf }
 0x447   :  { %v424_v40 = vpop.f32.mrb[12].mxu1  ;;  %v464_v41 = vsel %vm451_vm9, %v447_v38, -inf }
 0x448   :  { %v437_v42 = vmul.f32 0.35355338, %v424_v40  ;;  %465 = vmax.xlane.f32.xlu0 %v464_v41  ;;  %v1608_v43 = vpop.f32.mrb[13].mxu1  ;;  %v448_v44 = vsel %vm1934_vm10, %v436_v36, -inf }
 0x449   :  { %v427_v45 = vpop.f32.mrb[14].mxu1  ;;  %v467_v50 = vsel %vm451_vm9, %v448_v44, -inf }
 0x44a   :  { %v438_v51 = vmul.f32 0.35355338, %v427_v45  ;;  %468 = vmax.xlane.f32.xlu1 %v467_v50  ;;  %v1609_v52 = vpop.f32.mrb[15].mxu1  ;;  %v449_v53 = vsel %vm1930_vm8, %v437_v42, -inf }
 0x44b   :  { %v470_v54 = vsel %vm451_vm9, %v449_v53, -inf }
 0x44c   :  { %471 = vmax.xlane.f32.xlu0 %v470_v54  ;;  %v450_v55 = vsel %vm1934_vm10, %v438_v51, -inf }
 0x44d   :  { %v473_v56 = vsel %vm451_vm9, %v450_v55, -inf }
 0x44e   :  { %474 = vmax.xlane.f32.xlu1 %v473_v56 }
 0x45f   :  { %546 = vrot.lane.b32.xlu1 %v1890_v47, %s1790_s28 }
 0x462   :  { %544 = vrot.lane.b32.xlu0 %v1883_v46, %s1790_s28 }
 0x463   :  { %550 = vrot.lane.b32.xlu1 %v1898_v49, %s1790_s28 }
 0x466   :  { %548 = vrot.lane.b32.xlu0 %v1894_v48, %s1790_s28 }
 0x480   :  { %v454_v57 = vpop.xlane.xlu0 %453 }
 0x481   :  { %v476_v58 = vsub.f32 %v443_v15, %v454_v57 }
 0x482   :  { %v457_v59 = vpop.xlane.xlu1 %456 }
 0x483   :  { %v484_v60 = vmul.f32 1.442695, %v476_v58  ;;  %v477_v61 = vsub.f32 %v444_v17, %v457_v59 }
 0x485   :  { %1719 = vpow2.f32 %v484_v60  ;;  %v486_v62 = vmul.f32 1.442695, %v477_v61 }
 0x487   :  { %1721 = vpow2.f32 %v486_v62 }
 0x48f   :  { %v1720_v63 = vpop.eup %1719 }
 0x490   :  { %v500_v47 = vsel %vm451_vm9, %v1720_v63, 0.0 }
 0x491   :  { %v1722_v2 = vpop.eup %1721  ;;  %501 = vadd.xlane.f32.xlu1 %v500_v47 }
 0x492   :  { %v503_v46 = vsel %vm451_vm9, %v1722_v2, 0.0 }
 0x493   :  { %504 = vadd.xlane.f32.xlu0 %v503_v46 }
 0x4d1   :  { %v460_v49 = vpop.xlane.xlu0 %459 }
 0x4d2   :  { %v478_v3 = vsub.f32 %v445_v28, %v460_v49 }
 0x4d3   :  { %v463_v6 = vpop.xlane.xlu1 %462 }
 0x4d4   :  { %v488_v48 = vmul.f32 1.442695, %v478_v3  ;;  %v479_v7 = vsub.f32 %v446_v33, %v463_v6 }
 0x4d5   :  { %v466_v9 = vpop.xlane.xlu0 %465 }
 0x4d6   :  { %1723 = vpow2.f32 %v488_v48  ;;  %v490_v10 = vmul.f32 1.442695, %v479_v7  ;;  %v480_v11 = vsub.f32 %v447_v38, %v466_v9 }
 0x4d7   :  { %v469_v4 = vpop.xlane.xlu1 %468 }
 0x4d8   :  { %1725 = vpow2.f32 %v490_v10  ;;  %v492_v12 = vmul.f32 1.442695, %v480_v11  ;;  %v481_v13 = vsub.f32 %v448_v44, %v469_v4 }
 0x4d9   :  { %v472_v14 = vpop.xlane.xlu0 %471 }
 0x4da   :  { %1727 = vpow2.f32 %v492_v12  ;;  %v494_v15 = vmul.f32 1.442695, %v481_v13  ;;  %v482_v16 = vsub.f32 %v449_v53, %v472_v14 }
 0x4db   :  { %v475_v17 = vpop.xlane.xlu1 %474 }
 0x4dc   :  { %1729 = vpow2.f32 %v494_v15  ;;  %v496_v18 = vmul.f32 1.442695, %v482_v16  ;;  %v483_v22 = vsub.f32 %v450_v55, %v475_v17  ;;  %v1703_v16 = vld [vmem:[%s2114_s1 + $0x4] ss:$8 sps:$4 sm:$0xff]  }
 0x4dd   :  { %v545_v37 = vpop.permute.xlu0 %544 }
 0x4de   :  { %1731 = vpow2.f32 %v496_v18  ;;  %v498_v23 = vmul.f32 1.442695, %v483_v22  ;;  %v1706_v18 = vld [vmem:[%s2114_s1 + $0x14] ss:$8 sps:$4 sm:$0xff]   ;;  %s1791_s1 = smov 32  }
 0x4df   :  { %v547_v36 = vpop.permute.xlu1 %546 }
 0x4e0   :  { %v1724_v24 = vpop.eup %1723  ;;  %1733 = vpow2.f32 %v498_v23 }
 0x4e1   :  { %v506_v25 = vsel %vm451_vm9, %v1724_v24, 0.0  ;;  %v549_v40 = vpop.permute.xlu0 %548 }
 0x4e2   :  { %v1726_v26 = vpop.eup %1725  ;;  %507 = vadd.xlane.f32.xlu0 %v506_v25 }
 0x4e3   :  { %v509_v27 = vsel %vm451_vm9, %v1726_v26, 0.0  ;;  %v551_v38 = vpop.permute.xlu1 %550 }
 0x4e4   :  { %v1728_v28 = vpop.eup %1727  ;;  %510 = vadd.xlane.f32.xlu1 %v509_v27 }
 0x4e5   :  { %v512_v31 = vsel %vm451_vm9, %v1728_v28, 0.0 }
 0x4e6   :  { %v1730_v29 = vpop.eup %1729 }
 0x4e7   :  { %v515_v30 = vsel %vm451_vm9, %v1730_v29, 0.0 }
 0x4e8   :  { %v1732_v32 = vpop.eup %1731  ;;  %516 = vadd.xlane.f32.xlu0 %v515_v30  ;;  %513 = vadd.xlane.f32.xlu1 %v512_v31 }
 0x4e9   :  { %v518_v34 = vsel %vm451_vm9, %v1732_v32, 0.0 }
 0x4ea   :  { %v1734_v33 = vpop.eup %1733 }
 0x4eb   :  { %v521_v35 = vsel %vm451_vm9, %v1734_v33, 0.0 }
 0x4ec   :  { %519 = vadd.xlane.f32.xlu0 %v518_v34  ;;  %522 = vadd.xlane.f32.xlu1 %v521_v35 }
 0x519   :  { %556 = vxpose.xlu0.c.b16.start.end [1/1] (short) (narrow) %v545_v37, 16  ;;  %572 = vxpose.xlu1.c.b16.start.end [1/1] (short) (narrow) %v547_v36, 16 }
 0x51d   :  { %588 = vxpose.xlu0.c.b16.start.end [1/1] (short) (narrow) %v549_v40, 16  ;;  %604 = vxpose.xlu1.c.b16.start.end [1/1] (short) (narrow) %v551_v38, 16 }
 0x51e   :  { %v502_v41 = vpop.xlane.xlu1 %501 }
 0x51f   :  { %1735 = vrcp.f32 %v502_v41  ;;  %v1792_v41 = vmov 1983009808  }
 0x520   :  { %v505_v42 = vpop.xlane.xlu0 %504 }
 0x521   :  { %1737 = vrcp.f32 %v505_v42  ;;  %v935_v42 = vunpack.c.l.s4 %v1792_v41 }
 0x529   :  { %v1736_v43 = vpop.eup %1735 }
 0x52a   :  { %v532_v45 = vmul.f32 %v1736_v43, %v1720_v63 }
 0x52b   :  { %v1738_v44 = vpop.eup %1737 }
 0x52c   :  { %v533_v50 = vmul.f32 %v1738_v44, %v1722_v2  ;;  %v1793_v44 = vmov 1934713408  }
 0x52e   :  { %v540_v51 = vpack.c.bf16 %v533_v50, %v532_v45  ;;  %v967_v45 = vunpack.c.l.s4 %v1793_v44  ;;  %v936_v50 = vunpack.c.0.s8 %v935_v42 }
 0x530   :  { %v624_v52 = vsel %vm451_vm9, %v540_v51, 0 }
 0x531   :  { %1611 = vmatpush3.bf16.xpose.msra.mxu0 %v624_v52 }
 0x532   :  { %1622 = vmatprep.subr.bf16.mxu0 %v1785_v20 }
 0x56f   :  { %v508_v53 = vpop.xlane.xlu0 %507 }
 0x570   :  { %1739 = vrcp.f32 %v508_v53  ;;  %v968_v53 = vunpack.c.0.s8 %v967_v45 }
 0x571   :  { %v511_v54 = vpop.xlane.xlu1 %510 }
 0x572   :  { %1741 = vrcp.f32 %v511_v54  ;;  %v939_v54 = vsub.s32 %v936_v50, %v1839_v5 }
 0x575   :  { %v517_v55 = vpop.xlane.xlu0 %516  ;;  %v514_v56 = vpop.xlane.xlu1 %513 }
 0x576   :  { %1743 = vrcp.f32 %v517_v55 }
 0x577   :  { %1745 = vrcp.f32 %v514_v56 }
 0x579   :  { %v520_v57 = vpop.xlane.xlu0 %519  ;;  %v523_v58 = vpop.xlane.xlu1 %522 }
 0x57a   :  { %v1740_v59 = vpop.eup %1739  ;;  %1747 = vrcp.f32 %v520_v57 }
 0x57b   :  { %1749 = vrcp.f32 %v523_v58  ;;  %v534_v61 = vmul.f32 %v1740_v59, %v1724_v24 }
 0x57c   :  { %v1742_v60 = vpop.eup %1741 }
 0x57d   :  { %v535_v62 = vmul.f32 %v1742_v60, %v1726_v26 }
 0x57f   :  { %v541_v63 = vpack.c.bf16 %v535_v62, %v534_v61  ;;  %v564_v47 = vpop.trf.xlu0  ;;  %v580_v4 = vpop.trf.xlu1 }
 0x580   :  { %v1744_v2 = vpop.eup %1743  ;;  %1613 = vmatmul.mubr.msk.bf16.vlgmr.msra.gmra.mrb[4].mxu0 %vm451_vm9, %v564_v47 }
 0x581   :  { %v1746_v46 = vpop.eup %1745  ;;  %v670_v49 = vsel %vm451_vm9, %v541_v63, 0  ;;  %v537_v3 = vmul.f32 %v1744_v2, %v1730_v29  ;;  %1624 = vmatprep.mubr.msk.bf16.mxu0 %vm1786_vm1, %v1785_v20 }
 0x582   :  { %1617 = vmatpush3.bf16.xpose.msra.mxu1 %v670_v49  ;;  %v536_v6 = vmul.f32 %v1746_v46, %v1728_v28 }
 0x583   :  { %1628 = vmatprep.subr.bf16.mxu1 %v1785_v20  ;;  %v596_v15 = vpop.trf.xlu0  ;;  %v612_v17 = vpop.trf.xlu1 }
 0x584   :  { %v1748_v48 = vpop.eup %1747  ;;  %v542_v7 = vpack.c.bf16 %v537_v3, %v536_v6 }
 0x585   :  { %v1750_v9 = vpop.eup %1749  ;;  %v538_v10 = vmul.f32 %v1748_v48, %v1732_v32 }
 0x586   :  { %v716_v11 = vsel %vm451_vm9, %v542_v7, 0  ;;  %v539_v12 = vmul.f32 %v1750_v9, %v1734_v33 }
 0x587   :  { %1623 = vmatpush3.bf16.xpose.msra.mxu0 %v716_v11 }
 0x588   :  { %v543_v13 = vpack.c.bf16 %v539_v12, %v538_v10  ;;  %1634 = vmatprep.subr.bf16.mxu0 %v1785_v20 }
 0x589   :  { %1619 = vmatmul.mubr.msk.bf16.vlgmr.msra.gmra.mrb[16].mxu1 %vm451_vm9, %v580_v4 }
 0x58a   :  { %v762_v14 = vsel %vm451_vm9, %v543_v13, 0  ;;  %1630 = vmatprep.mubr.msk.bf16.mxu1 %vm1786_vm1, %v1785_v20 }
 0x58b   :  { %1629 = vmatpush3.bf16.xpose.msra.mxu1 %v762_v14 }
 0x58c   :  { %1642 = vmatprep.subr.bf16.mxu1 %v1785_v20 }
 0x58e   :  { %1625 = vmatmul.mubr.msk.bf16.vlgmr.msra.gmra.mrb[8].mxu0 %vm451_vm9, %v596_v15 }
 0x58f   :  { %1638 = vmatprep.mubr.msk.bf16.mxu0 %vm1786_vm1, %v1785_v20 }
 0x592   :  { %1631 = vmatmul.mubr.msk.bf16.vlgmr.msra.gmra.mrb[20].mxu1 %vm451_vm9, %v612_v17 }
 0x593   :  { %1643 = vmatpush3.bf16.msra.mxu1 %v1703_v16  ;;  %1646 = vmatprep.mubr.msk.bf16.mxu1 %vm1786_vm1, %v1785_v20 }
 0x594   :  { %1644 = vmatprep.subr.bf16.mxu1 %v1785_v20 }
 0x597   :  { %1645 = vmatpush3.bf16.msra.mxu1 %v1706_v18 }
 0x653   :  { %v660_v22 = vpop.f32.mrb[4].mxu0 }
 0x654   :  { %804 = vxpose.xlu0.b32.start.end [1/1] (short) (narrow) %v660_v22, 16  ;;  %v1614_v23 = vpop.f32.mrb[5].mxu0 }
 0x655   :  { %v663_v24 = vpop.f32.mrb[6].mxu0 }
 0x656   :  { %v1615_v25 = vpop.f32.mrb[7].mxu0 }
 0x65c   :  { %v706_v26 = vpop.f32.mrb[16].mxu1 }
 0x65d   :  { %v1620_v27 = vpop.f32.mrb[17].mxu1  ;;  %836 = vxpose.xlu1.b32.start.end [1/1] (short) (narrow) %v706_v26, 16 }
 0x65e   :  { %v709_v28 = vpop.f32.mrb[18].mxu1 }
 0x65f   :  { %v1621_v29 = vpop.f32.mrb[19].mxu1 }
 0x661   :  { %v752_v30 = vpop.f32.mrb[8].mxu0 }
 0x662   :  { %868 = vxpose.xlu0.b32.start.end [1/1] (short) (narrow) %v752_v30, 16  ;;  %v1626_v31 = vpop.f32.mrb[9].mxu0 }
 0x663   :  { %v755_v32 = vpop.f32.mrb[10].mxu0 }
 0x664   :  { %v1627_v33 = vpop.f32.mrb[11].mxu0 }
 0x665   :  { %v798_v34 = vpop.f32.mrb[20].mxu1 }
 0x666   :  { %v1632_v35 = vpop.f32.mrb[21].mxu1 }
 0x667   :  { %900 = vxpose.xlu0.b32.start.end [1/1] (short) (narrow) %v798_v34, 16  ;;  %v801_v36 = vpop.f32.mrb[22].mxu1 }
 0x668   :  { %v1633_v37 = vpop.f32.mrb[23].mxu1 }
 0x67f   :  { %1236 = vrot.lane.b32.xlu1 %v1856_v19, %s1791_s1  ;;  %v2009_v19 = vsub.s32 %v968_v53, %v1839_v5 }
 0x6d4   :  { %v820_v38 = vpop.trf.xlu0 }
 0x6d8   :  { %v821_v40 = vpop.trf.xlu0 }
 0x6dd   :  { %v852_v52 = vpop.trf.xlu1 }
 0x6e1   :  { %v853_v47 = vpop.trf.xlu1 }
 0x6e2   :  { %v884_v43 = vpop.trf.xlu0 }
 0x6e3   :  { %v932_v55 = vcombine.low %v820_v38, %v884_v43  ;;  %v933_v56 = vcombine.high %v820_v38, %v884_v43 }
 0x6e5   :  { %v940_v60 = vrot.slane %v932_v55, %v939_v54  ;;  %v947_v61 = vrot.slane %v933_v56, %v939_v54 }
 0x6e6   :  { %v885_v51 = vpop.trf.xlu0 }
 0x6e7   :  { %v1000_v2 = vcombine.low %v821_v40, %v885_v51  ;;  %v1001_v46 = vcombine.high %v821_v40, %v885_v51 }
 0x6e9   :  { %v1008_v15 = vrot.slane %v1000_v2, %v939_v54  ;;  %v1015_v16 = vrot.slane %v1001_v46, %v939_v54 }
 0x6ea   :  { %v916_v57 = vpop.trf.xlu0 }
 0x6eb   :  { %v948_v58 = vcombine.low %v852_v52, %v916_v57  ;;  %v949_v59 = vcombine.high %v852_v52, %v916_v57 }
 0x6ed   :  { %v956_v62 = vrot.slane %v948_v58, %v939_v54  ;;  %v963_v63 = vrot.slane %v949_v59, %v939_v54 }
 0x6ee   :  { %v917_v49 = vpop.trf.xlu0 }
 0x6ef   :  { %v964_v3 = vcombine.low %v940_v60, %v956_v62  ;;  %v965_v6 = vcombine.high %v940_v60, %v956_v62  ;;  %v980_v48 = vcombine.low %v947_v61, %v963_v63  ;;  %v981_v7 = vcombine.high %v947_v61, %v963_v63 }
 0x6f0   :  { %v1016_v9 = vcombine.low %v853_v47, %v917_v49  ;;  %v1017_v10 = vcombine.high %v853_v47, %v917_v49 }
 0x6f1   :  { %v972_v11 = vrot.slane %v964_v3, %v2009_v19  ;;  %v979_v4 = vrot.slane %v965_v6, %v2009_v19  ;;  %v988_v12 = vrot.slane %v980_v48, %v2009_v19  ;;  %v995_v13 = vrot.slane %v981_v7, %v2009_v19  ;;  %v1237_v14 = vpop.permute.xlu1 %1236 }
 0x6f2   :  { %v1024_v17 = vrot.slane %v1016_v9, %v939_v54  ;;  %v1031_v18 = vrot.slane %v1017_v10, %v939_v54  ;;  %1635 = vmatpush3.bf16.msra.mxu0 %v1237_v14 }
 0x6f3   :  { %v1068_v22 = vcombine.low %v972_v11, %v979_v4  ;;  %v1528_v23 = vcombine.high %v972_v11, %v979_v4  ;;  %v1084_v24 = vcombine.low %v988_v12, %v995_v13  ;;  %v1529_v25 = vcombine.high %v988_v12, %v995_v13  ;;  %1636 = vmatprep.subr.bf16.mxu0 %v1785_v20 }
 0x6f4   :  { %v1032_v26 = vcombine.low %v1008_v15, %v1024_v17  ;;  %v1033_v27 = vcombine.high %v1008_v15, %v1024_v17  ;;  %v1048_v28 = vcombine.low %v1015_v16, %v1031_v18  ;;  %v1049_v29 = vcombine.high %v1015_v16, %v1031_v18 }
 0x6f5   :  { %v1075_v30 = vrot.slane %v1068_v22, %v939_v54  ;;  %v1083_v31 = vrot.slane %v1528_v23, %v939_v54  ;;  %v1091_v32 = vrot.slane %v1084_v24, %v939_v54  ;;  %v1099_v33 = vrot.slane %v1529_v25, %v939_v54 }
 0x6f6   :  { %v1040_v34 = vrot.slane %v1032_v26, %v2009_v19  ;;  %v1047_v35 = vrot.slane %v1033_v27, %v2009_v19  ;;  %v1056_v36 = vrot.slane %v1048_v28, %v2009_v19  ;;  %v1063_v37 = vrot.slane %v1049_v29, %v2009_v19 }
 0x6f7   :  { %v1101_v38 = vcombine.high %v1075_v30, %v1083_v31  ;;  %v1117_v40 = vcombine.high %v1091_v32, %v1099_v33  ;;  %v1100_v41 = vcombine.low %v1075_v30, %v1083_v31  ;;  %v1116_v42 = vcombine.low %v1091_v32, %v1099_v33 }
 0x6f8   :  { %v1136_v43 = vcombine.low %v1040_v34, %v1047_v35  ;;  %v1530_v44 = vcombine.high %v1040_v34, %v1047_v35  ;;  %v1152_v45 = vcombine.low %v1056_v36, %v1063_v37  ;;  %v1531_v50 = vcombine.high %v1056_v36, %v1063_v37 }
 0x6f9   :  { %v1108_v51 = vrot.slane %v1100_v41, %v2009_v19  ;;  %v1124_v52 = vrot.slane %v1116_v42, %v2009_v19  ;;  %v1115_v58 = vrot.slane %v1101_v38, %v2009_v19  ;;  %v1131_v59 = vrot.slane %v1117_v40, %v2009_v19 }
 0x6fa   :  { %v1143_v53 = vrot.slane %v1136_v43, %v939_v54  ;;  %v1151_v55 = vrot.slane %v1530_v44, %v939_v54  ;;  %v1159_v56 = vrot.slane %v1152_v45, %v939_v54  ;;  %v1167_v57 = vrot.slane %v1531_v50, %v939_v54 }
 0x6fb   :  { %v1132_v60 = vcombine.low %v1108_v51, %v1124_v52  ;;  %v1134_v6 = vcombine.low %v1115_v58, %v1131_v59  ;;  %v1133_v54 = vcombine.high %v1108_v51, %v1124_v52  ;;  %v1135_v12 = vcombine.high %v1115_v58, %v1131_v59 }
 0x6fc   :  { %v1169_v61 = vcombine.high %v1143_v53, %v1151_v55  ;;  %v1185_v62 = vcombine.high %v1159_v56, %v1167_v57  ;;  %v1168_v63 = vcombine.low %v1143_v53, %v1151_v55  ;;  %v1184_v47 = vcombine.low %v1159_v56, %v1167_v57 }
 0x6fe   :  { %v1183_v2 = vrot.slane %v1169_v61, %v2009_v19  ;;  %v1199_v46 = vrot.slane %v1185_v62, %v2009_v19  ;;  %v1176_v49 = vrot.slane %v1168_v63, %v2009_v19  ;;  %v1192_v3 = vrot.slane %v1184_v47, %v2009_v19 }
 0x700   :  { %v1202_v48 = vcombine.low %v1183_v2, %v1199_v46  ;;  %v1201_v7 = vcombine.high %v1176_v49, %v1192_v3  ;;  %v1200_v9 = vcombine.low %v1176_v49, %v1192_v3  ;;  %v1203_v4 = vcombine.high %v1183_v2, %v1199_v46 }
 0x702   :  { %v1691_v10 = vpack.i.bf16 %v1202_v48, %v1134_v6  ;;  %v1686_v11 = vpack.i.bf16 %v1201_v7, %v1133_v54  ;;  %v1696_v13 = vpack.i.bf16 %v1203_v4, %v1135_v12  ;;  %v1711_v4 = vld [vmem:[%s2115_s2 + $0x20] sm:$0xff]   ;;  %v1712_v12 = vld [vmem:[%s2115_s2 + $0x28] sm:$0xff]  }
 0x704   :  { %1692 = vrot.lane.b32.xlu1 %v1691_v10, %s1794_s7  ;;  %1687 = vrot.lane.b32.xlu0 %v1686_v11, %s1795_s8  ;;  %v1709_v10 = vld [vmem:[%s2115_s2 + $0x10] sm:$0xff]   ;;  %v1710_v11 = vld [vmem:[%s2115_s2 + $0x18] sm:$0xff]  }
 0x708   :  { %1697 = vrot.lane.b32.xlu1 %v1696_v13, %s1796_s9  ;;  %v1713_v13 = vld [vmem:[%s2115_s2 + $0x30] sm:$0xff]  }
 0x70c   :  { %1238 = vrot.lane.b32.xlu1 %v1865_v21, %s1791_s1 }
 0x710   :  { %1243 = vrot.lane.b32.xlu1 %v1879_v39, %s1791_s1 }
 0x776   :  { %v1693_v19 = vpop.permute.xlu1 %1692  ;;  %v1688_v14 = vpop.permute.xlu0 %1687 }
 0x777   :  { %v1690_v15 = vunpack.i.h.bf16 %v1688_v14  ;;  %v1689_v16 = vunpack.i.l.bf16 %v1688_v14  ;;  %v1695_v17 = vunpack.i.h.bf16 %v1693_v19  ;;  %v1694_v18 = vunpack.i.l.bf16 %v1693_v19  ;;  %v1714_v19 = vld [vmem:[%s2115_s2 + $0x38] sm:$0xff]  }
 0x778   :  { %v1331_v14 = vsub.s32 2, %v1839_v5 }
 0x779   :  { %v1228_v22 = vsel %vm241_vm3, %v1132_v60, %v1689_v16  ;;  %v1229_v23 = vsel %vm241_vm3, %v1200_v9, %v1690_v15  ;;  %v1708_v9 = vld [vmem:[%s2115_s2 + $0x8] sm:$0xff]   ;;  %v1759_v15 = vld [vmem:[%s2116_s3] sm:$0xf] }
 0x77a   :  { %v1698_v24 = vpop.permute.xlu1 %1697  ;;  %v1230_v27 = vsel %vm451_vm9, %v1228_v22, %v1694_v18  ;;  %v1231_v21 = vsel %vm451_vm9, %v1229_v23, %v1695_v17  ;;  %v1332_v16 = vrot.slane %v1759_v15, %v1331_v14 }
 0x77b   :  { %v1700_v25 = vunpack.i.h.bf16 %v1698_v24  ;;  %v1699_v26 = vunpack.i.l.bf16 %v1698_v24 }
 0x77d   :  { %v1233_v28 = vsel %vm1232_vm11, %v1230_v27, %v1699_v26  ;;  %v1234_v39 = vsel %vm1232_vm11, %v1231_v21, %v1700_v25 }
 0x77e   :  { %v1235_v29 = vpack.c.bf16 %v1234_v39, %v1233_v28  ;;  %v1239_v30 = vpop.permute.xlu1 %1238 }
 0x77f   :  { %1637 = vmatpush3.bf16.msra.mxu0 %v1239_v30 }
 0x780   :  { %1650 = vmatprep.subr.bf16.mxu0 %v1785_v20 }
 0x782   :  { %1639 = vmatmul.mubr.msk.bf16.vlgmr.msra.gmra.mrb[12].mxu0 %vm42_vm0, %v1235_v29  ;;  %v1244_v31 = vpop.permute.xlu1 %1243 }
 0x783   :  { %1666 = vmatprep.mubr.msk.bf16.mxu0 %vm1786_vm1, %v1785_v20 }
 0x855   :  { %v1283_v32 = vpop.f32.mrb[12].mxu0 }
 0x856   :  { %v1284_v33 = vadd.f32 %v1283_v32, %v1244_v31  ;;  %v1640_v34 = vpop.f32.mrb[13].mxu0 }
 0x857   :  { %v1286_v35 = vpop.f32.mrb[14].mxu0 }
 0x858   :  { %v2042_v36 = vadd.f32 %v1284_v33, %v1827_v0  ;;  %v1287_v37 = vadd.f32 %v1286_v35, %v1244_v31  ;;  %v1641_v38 = vpop.f32.mrb[15].mxu0 }
 0x85a   :  { %v2045_v40 = vadd.f32 %v1287_v37, %v1832_v1  ;;  %v1292_v41 = vsel %vm42_vm0, %v2042_v36, 0.0 }
 0x85b   :  { %1293 = vadd.xlane.f32.xlu0 %v1292_v41 }
 0x85c   :  { %v1295_v42 = vsel %vm42_vm0, %v2045_v40, 0.0 }
 0x85d   :  { %1296 = vadd.xlane.f32.xlu1 %v1295_v42 }
 0x86e   :  { %1318 = vrot.lane.b32.xlu1 %v1845_v8, %s1790_s28 }
 0x8e8   :  { %v1294_v43 = vpop.xlane.xlu0 %1293 }
 0x8e9   :  { %v1298_v44 = vmul.f32 0.03125, %v1294_v43 }
 0x8ea   :  { %v1297_v0 = vpop.xlane.xlu1 %1296 }
 0x8eb   :  { %v1300_v45 = vsub.f32 %v2042_v36, %v1298_v44  ;;  %v1299_v50 = vmul.f32 0.03125, %v1297_v0  ;;  %v1406_v0 = vsub.s32 3, %v1839_v5 }
 0x8ed   :  { %v1301_v1 = vsub.f32 %v2045_v40, %v1299_v50  ;;  %v1302_v51 = vmul.f32 %v1300_v45, %v1300_v45 }
 0x8ee   :  { %v1319_v47 = vpop.permute.xlu1 %1318 }
 0x8ef   :  { %v1304_v52 = vsel %vm42_vm0, %v1302_v51, 0.0  ;;  %v1303_v53 = vmul.f32 %v1301_v1, %v1301_v1 }
 0x8f0   :  { %1305 = vadd.xlane.f32.xlu0 %v1304_v52 }
 0x8f1   :  { %v1307_v55 = vsel %vm42_vm0, %v1303_v53, 0.0 }
 0x8f4   :  { %1308 = vadd.xlane.f32.xlu0 %v1307_v55 }
 0x90a   :  { %1323 = vrot.lane.b32.xlu0 %v1845_v8, %s1791_s1  ;;  %v1707_v8 = vld [vmem:[%s2115_s2] sm:$0xff]   ;;  %s1797_s2 = smov [#allocation2]  }
 0x90b   :  { %1651 = vmatpush3.bf16.msra.mxu0 %v1707_v8  ;;  %s1506_s3 = sshll.u32 %s1797_s2, 4  ;;  %s1507_s3 = int_to_ptr.vmem [resolvable:$true] %s1506_s3 }
 0x90c   :  { %1652 = vmatprep.subr.bf16.mxu0 %v1785_v20  ;;  %s1760_s27 = scalar_lea.vmem %s1507_s3, 256  ;;  %p1765_p1 = scmp.lt.s32.totalorder %s1507_s3, %s1507_s3 }
 0x90d   :  { %p1761_p0 = scmp.ne.s32.totalorder %s1507_s3, %s1760_s27  ;;  %p1766_p2 = scmp.lt.s32.totalorder %s1760_s27, %s1760_s27 }
 0x90f   :  { %1653 = vmatpush3.bf16.msra.mxu0 %v1708_v9  ;;  %p1767_p3 = por %p1766_p2, %p1765_p1 }
 0x910   :  { %1654 = vmatprep.subr.bf16.mxu0 %v1785_v20 }
 0x911   :  { %p1768_p4 = pnand %p1767_p3, %p1761_p0 }
 0x913   :  { %1655 = vmatpush3.bf16.msra.mxu0 %v1709_v10 }
 0x914   :  { %1656 = vmatprep.subr.bf16.mxu0 %v1785_v20 }
 0x917   :  { %1657 = vmatpush3.bf16.msra.mxu0 %v1710_v11 }
 0x918   :  { %1658 = vmatprep.subr.bf16.mxu0 %v1785_v20 }
 0x91b   :  { %1659 = vmatpush3.bf16.msra.mxu0 %v1711_v4 }
 0x91c   :  { %1660 = vmatprep.subr.bf16.mxu0 %v1785_v20 }
 0x91f   :  { %1661 = vmatpush3.bf16.msra.mxu0 %v1712_v12 }
 0x920   :  { %1662 = vmatprep.subr.bf16.mxu0 %v1785_v20 }
 0x923   :  { %1663 = vmatpush3.bf16.msra.mxu0 %v1713_v13 }
 0x924   :  { %1664 = vmatprep.subr.bf16.mxu0 %v1785_v20 }
 0x927   :  { %1665 = vmatpush3.bf16.msra.mxu0 %v1714_v19 }
 0x97d   :  { %v1306_v56 = vpop.xlane.xlu0 %1305 }
 0x97e   :  { %v1310_v57 = vmul.f32 0.03125, %v1306_v56 }
 0x980   :  { %v1312_v58 = vadd.f32 1e-05, %v1310_v57 }
 0x981   :  { %v1309_v59 = vpop.xlane.xlu0 %1308 }
 0x982   :  { %1751 = vrsqrt.f32 %v1312_v58  ;;  %v1311_v60 = vmul.f32 0.03125, %v1309_v59 }
 0x984   :  { %v1313_v61 = vadd.f32 1e-05, %v1311_v60 }
 0x985   :  { %v1324_v3 = vpop.permute.xlu0 %1323 }
 0x986   :  { %1753 = vrsqrt.f32 %v1313_v61 }
 0x98c   :  { %v1752_v62 = vpop.eup %1751 }
 0x98d   :  { %v1316_v63 = vmul.f32 %v1752_v62, %v1300_v45  ;;  %v1407_v45 = vrot.slane %v1759_v15, %v1406_v0 }
 0x98f   :  { %v1321_v49 = vmul.f32 %v1319_v47, %v1316_v63 }
 0x990   :  { %v1754_v2 = vpop.eup %1753 }
 0x991   :  { %v1317_v46 = vmul.f32 %v1754_v2, %v1301_v1  ;;  %v1326_v48 = vadd.f32 %v1324_v3, %v1321_v49 }
 0x993   :  { %v1322_v6 = vmul.f32 %v1319_v47, %v1317_v46 }
 0x995   :  { %v1327_v54 = vadd.f32 %v1324_v3, %v1322_v6 }
 0x997   :  { %v1328_v7 = vpack.c.bf16 %v1327_v54, %v1326_v48 }
 0x999   :  { %1647 = vmatmul.mubr.msk.bf16.vlgmr.msra.gmra.mrb[24].mxu1 %vm42_vm0, %v1328_v7 }
 0xa6c   :  { %v1378_v17 = vpop.f32.mrb[24].mxu1 }
 0xa6d   :  { %v1379_v18 = vadd.f32 %v1378_v17, %v1332_v16  ;;  %v1648_v22 = vpop.f32.mrb[25].mxu1 }
 0xa6e   :  { %v1381_v23 = vpop.f32.mrb[26].mxu1 }
 0xa6f   :  { %v1387_v24 = vmul.f32 %v1379_v18, %v1379_v18  ;;  %v1382_v25 = vadd.f32 %v1381_v23, %v1332_v16  ;;  %v1649_v26 = vpop.f32.mrb[27].mxu1  ;;  %v1385_v37 = vmul.f32 0.5, %v1379_v18 }
 0xa71   :  { %v1389_v27 = vmul.f32 %v1387_v24, %v1379_v18  ;;  %v1388_v21 = vmul.f32 %v1382_v25, %v1382_v25  ;;  %v1386_v38 = vmul.f32 0.5, %v1382_v25 }
 0xa73   :  { %v1391_v28 = vmul.f32 0.044715, %v1389_v27  ;;  %v1390_v39 = vmul.f32 %v1388_v21, %v1382_v25 }
 0xa75   :  { %v1393_v20 = vadd.f32 %v1391_v28, %v1379_v18  ;;  %v1392_v29 = vmul.f32 0.044715, %v1390_v39 }
 0xa77   :  { %v1395_v30 = vmul.f32 0.7978846, %v1393_v20  ;;  %v1394_v31 = vadd.f32 %v1392_v29, %v1382_v25 }
 0xa79   :  { %1755 = vtanh.f32 %v1395_v30  ;;  %v1396_v32 = vmul.f32 0.7978846, %v1394_v31 }
 0xa7b   :  { %1757 = vtanh.f32 %v1396_v32 }
 0xa83   :  { %v1756_v33 = vpop.eup %1755 }
 0xa84   :  { %v1399_v34 = vadd.f32 1.0, %v1756_v33 }
 0xa85   :  { %v1758_v35 = vpop.eup %1757 }
 0xa86   :  { %v1400_v41 = vadd.f32 1.0, %v1758_v35  ;;  %v1401_v42 = vmul.f32 %v1399_v34, %v1385_v37 }
 0xa88   :  { %v1402_v43 = vmul.f32 %v1400_v41, %v1386_v38 }
 0xa8a   :  { %v1403_v44 = vpack.c.bf16 %v1402_v43, %v1401_v42 }
 0xa8c   :  { %1667 = vmatmul.mubr.bf16.vlgmr.msra.gmra.mrb[16].mxu0 %v1403_v44 }
 0xb5f   :  { %v1490_v50 = vpop.f32.mrb[16].mxu0 }
 0xb60   :  { %v1491_v1 = vadd.f32 %v1490_v50, %v1407_v45  ;;  %v1668_v51 = vpop.f32.mrb[17].mxu0 }
 0xb61   :  { %v1493_v52 = vpop.f32.mrb[18].mxu0 }
 0xb62   :  { %v1497_v53 = vadd.f32 %v1491_v1, %v2042_v36  ;;  %v1494_v55 = vadd.f32 %v1493_v52, %v1407_v45  ;;  %v1669_v56 = vpop.f32.mrb[19].mxu0 }
 0xb64   :  { %1499 = vst.msk [vmem:[#allocation2] sm:$0xff] %vm42_vm0, %v1497_v53  ;;  %v1498_v57 = vadd.f32 %v1494_v55, %v2045_v40 }
 0xb66   :  { %1500 = vst.msk [vmem:[#allocation2 + $0x8] sm:$0xff] %vm42_vm0, %v1498_v57 }
 0xb67   :  { %1771 = shalt.err (!%p1768_p4)
}
 0xb68   :  { %s1772_s30 = scalar_lea.hbm %s2117_s4, 256 }
 0xb69   :  { %p1773_p5 = scmp.ne.s32.totalorder %s2117_s4, %s1772_s30  ;;  %p1776_p6 = scmp.lt.u32.totalorder %s1772_s30, %s2117_s4 }
 0xb6b   :  { %p1778_p7 = pnand %p1776_p6, %p1773_p5 }
 0xb6d   :  { %1781 = shalt.err (!%p1778_p7)
}
 0xb6e   :  { %s1798_s9 = smov 128  }
 0xb6f   :  { %1512 = dma.vmem_to_hbm [thread:$0]  %s1507_s3, 256, %s2117_s4, [#allocation3], %s1798_s9, %s1798_s9, %s1795_s8  }
 0xb70   :  { %1782 = dma.done.wait [#allocation3], 256  }
 0xb71   :  { %1783 = vsyncadd [#allocation3], 4294967040 }
 0xb72   :  { %1516 = vsyncpa [#allocation3], 1 }

</bundles_post_ra>
